<compile_context>
chip_gen: v5e
topology: v5e:2x2
jax: 0.10.0
libtpu: 0.0.40
codegen_flags: <defaults>
</compile_context>

<pallas_src>
import functools

import numpy as np
import jax
import jax.numpy as jnp
from jax.experimental import pallas as pl
from jax.experimental.pallas import tpu as pltpu

_NEG = -1.0e30  # finite stand-in for -inf (keeps exp/log NaN-free in f32)


def _round_up(x, m):
    return ((x + m - 1) // m) * m


# --------------------- Phase 1: log-softmax + blank/label gather -------------
def _logprob_kernel(logits_ref, labels_ref, out_ref, *, blank):
    x = logits_ref[...]                                      # (tile_rows, vocab_pad)
    m = jnp.max(x, axis=-1, keepdims=True)
    e = jnp.exp(x - m)                                       # single exp sweep
    lse = m + jnp.log(jnp.sum(e, axis=-1, keepdims=True))    # (tile_rows, 1)

    # blank column via static lane slice (blank is a Python int)
    out_ref[:, 0:1] = x[:, blank:blank + 1] - lse            # lp_blank

    # per-row label gather via one-hot select
    labels = labels_ref[...]                                 # (tile_rows, 1) int32
    vocab_iota = jax.lax.broadcasted_iota(jnp.int32, x.shape, 1)
    picked = jnp.sum(jnp.where(vocab_iota == labels, x, 0.0), axis=-1, keepdims=True)
    out_ref[:, 1:2] = picked - lse                           # lp_label


# --------------------- Phase 2: wavefront DP over anti-diagonals -------------
def _dp_kernel(lpb_ref, lpl_ref, dcap_ref, out_ref, beta_ref, cap_ref):
    # lpb_ref / lpl_ref: (td, nb, max_u1p) chunk of skewed log-probs, where for
    # global recurrence step S = c*td + s:
    #   lpb[s, b, u] = lp_blank at lattice cell (t = S - u,     u)
    #   lpl[s, b, u] = lp_label at lattice cell (t = S - u + 1, u - 1)
    #                  (label term pre-shifted by +1 in u; NEG at u == 0 so the
    #                   roll wraparound at lane 0 stays harmless)
    c = pl.program_id(1)
    td = lpb_ref.shape[0]
    nb, u1p = out_ref.shape

    @pl.when(c == 0)
    def _():
        lane = jax.lax.broadcasted_iota(jnp.int32, (nb, u1p), 1)
        beta0 = jnp.where(lane == 0, 0.0, _NEG).astype(jnp.float32)
        beta_ref[...] = beta0          # alpha along diagonal 0 (alpha[0,0] = 0)
        cap_ref[...] = beta0           # default capture (handles T=1, U=0)

    dcap = dcap_ref[...]               # (nb, 1) int32, capture step = T+U-2
    base = c * td

    def body(s, carry):
        beta, cap = carry
        a = beta + lpb_ref[s]                                   # blank: from (t-1, u)
        b = pltpu.roll(beta, shift=1, axis=1) + lpl_ref[s]      # label: from (t, u-1)
        mx = jnp.maximum(a, b)
        mn = jnp.minimum(a, b)
        new = mx + jnp.log(1.0 + jnp.exp(mn - mx))              # one-exp logaddexp
        new = jnp.maximum(new, _NEG)                            # clamp padding lanes
        cap = jnp.where(base + s == dcap, new, cap)
        return new, cap

    beta, cap = jax.lax.fori_loop(0, td, body,
                                  (beta_ref[...], cap_ref[...]), unroll=2)
    beta_ref[...] = beta
    cap_ref[...] = cap
    out_ref[...] = cap


def transducer_loss(logits, targets, logit_lengths, target_lengths, blank,
                    reduction="mean"):
    assert reduction in ("mean", "sum")
    # Spec requires f32 logits; keep f32 end-to-end for exactness.
    logits = jnp.asarray(logits, jnp.float32)
    targets = jnp.asarray(targets, jnp.int32)

    t_list = [int(t) for t in np.asarray(logit_lengths)]
    u_list = [int(u) for u in np.asarray(target_lengths)]
    batch = len(t_list)
    vocab = int(logits.shape[1])
    rows = int(logits.shape[0])

    off_list, off = [], 0
    for b in range(batch):
        off_list.append(off)
        off += t_list[b] * (u_list[b] + 1)
    assert off == rows, (off, rows)

    # ---- phase 1: packed layout, vocab padded to 128 lanes, row-tiled --------
    vocab_pad = _round_up(vocab, 128)
    bytes_per_row = vocab_pad * 4
    # ~6 MiB logits tile: per-grid-step pipeline overhead (~0.35 us) becomes
    # negligible vs the HBM DMA on all generations.
    tile_rows = max(8, ((6 << 20) // bytes_per_row) // 8 * 8)
    tile_rows = min(tile_rows, _round_up(rows, 8))
    rows_pad = _round_up(rows, tile_rows)

    logits_p = jnp.pad(logits, ((0, rows_pad - rows), (0, vocab_pad - vocab)),
                       constant_values=_NEG)

    # per-row label ids (u-th token of the owning utterance; unused at u == U_b)
    targets_np = np.asarray(targets)
    row_labels_np = np.zeros((rows_pad, 1), np.int32)
    for b in range(batch):
        tb_, ub_ = t_list[b], u_list[b]
        per_t = np.zeros((ub_ + 1,), np.int32)
        if ub_ > 0:
            per_t[:ub_] = targets_np[b, :ub_]
        row_labels_np[off_list[b]:off_list[b] + tb_ * (ub_ + 1), 0] = np.tile(per_t, tb_)
    row_labels = jnp.asarray(row_labels_np)

    vmem1 = 2 * tile_rows * (vocab_pad + 3) * 4 + (4 << 20)
    vmem1 = min(max(vmem1, 32 << 20), 62 << 20)
    lp_packed = pl.pallas_call(
        functools.partial(_logprob_kernel, blank=int(blank)),
        grid=(rows_pad // tile_rows,),
        in_specs=[pl.BlockSpec((tile_rows, vocab_pad), lambda i: (i, 0)),
                  pl.BlockSpec((tile_rows, 1), lambda i: (i, 0))],
        out_specs=pl.BlockSpec((tile_rows, 2), lambda i: (i, 0)),
        out_shape=jax.ShapeDtypeStruct((rows_pad, 2), jnp.float32),
        compiler_params=pltpu.CompilerParams(
            dimension_semantics=("parallel",), vmem_limit_bytes=vmem1),
    )(logits_p, row_labels)
    lpb_flat = lp_packed[:, 0]
    lpl_flat = lp_packed[:, 1]

    # ---- glue: skewed (wavefront) DP inputs with tiny XLA gathers ------------
    # TODO(synk): for very short U with huge batches, a transposed layout
    # (u on sublanes, utterances on lanes) and/or fusing the skew-gather into
    # the DP kernel via manual DMA would cut glue bytes further.
    max_t = max(t_list)
    max_u = max(u_list)
    max_u1p = _round_up(max_u + 1, 128)              # lane-dense U axis
    n_src = max(1, max_t + max_u - 1)                # number of recurrence steps

    b_pad8 = _round_up(batch, 8)
    nb = min(32, b_pad8)                             # utterances per kernel block
    b_pad = _round_up(batch, nb)

    # diagonal-chunk length: ~4 MiB per (input, pipeline buffer) keeps Phase-2
    # VMEM bounded independent of sequence length (fits v7x's 64 MiB/TC).
    td = max(1, min(n_src, (4 << 20) // (nb * max_u1p * 4)))
    n_src_pad = _round_up(n_src, td)

    t_arr = jnp.asarray(t_list + [0] * (b_pad - batch), jnp.int32)
    u_arr = jnp.asarray(u_list + [0] * (b_pad - batch), jnp.int32)
    o_arr = jnp.asarray(off_list + [0] * (b_pad - batch), jnp.int32)

    s_i = jnp.arange(n_src_pad, dtype=jnp.int32)[:, None, None]
    u_i = jnp.arange(max_u1p, dtype=jnp.int32)[None, None, :]
    tb = t_arr[None, :, None]
    ub = u_arr[None, :, None]
    ob = o_arr[None, :, None]

    t_b = s_i - u_i                                   # blank source cell (t, u)
    valid_b = (t_b >= 0) & (t_b < tb) & (u_i <= ub)
    row_b = ob + t_b * (ub + 1) + u_i
    lpb_skew = jnp.where(valid_b, lpb_flat[jnp.where(valid_b, row_b, 0)],
                         _NEG).astype(jnp.float32)

    # label term pre-shifted by +1 along u: source cell (t = s-u+1, u-1), whose
    # packed row is row_b + ub — the shift is folded into the gather index so
    # no extra full-size tensor (concat) is materialized.
    valid_l = (u_i >= 1) & (t_b + 1 >= 0) & (t_b + 1 < tb) & (u_i <= ub)
    lpl_skew = jnp.where(valid_l, lpl_flat[jnp.where(valid_l, row_b + ub, 0)],
                         _NEG).astype(jnp.float32)

    dcap = (t_arr + u_arr - 2)[:, None].astype(jnp.int32)     # capture step T+U-2

    vmem2 = (2 * 2 * td * nb * max_u1p + 4 * nb * max_u1p) * 4 + (4 << 20)
    vmem2 = min(max(vmem2, 32 << 20), 62 << 20)
    beta_rows = pl.pallas_call(
        _dp_kernel,
        grid=(b_pad // nb, n_src_pad // td),
        in_specs=[pl.BlockSpec((td, nb, max_u1p), lambda i, c: (c, i, 0)),
                  pl.BlockSpec((td, nb, max_u1p), lambda i, c: (c, i, 0)),
                  pl.BlockSpec((nb, 1), lambda i, c: (i, 0))],
        out_specs=pl.BlockSpec((nb, max_u1p), lambda i, c: (i, 0)),
        out_shape=jax.ShapeDtypeStruct((b_pad, max_u1p), jnp.float32),
        scratch_shapes=[pltpu.VMEM((nb, max_u1p), jnp.float32),
                        pltpu.VMEM((nb, max_u1p), jnp.float32)],
        compiler_params=pltpu.CompilerParams(
            dimension_semantics=("parallel", "arbitrary"),
            vmem_limit_bytes=vmem2),
    )(lpb_skew, lpl_skew, dcap)

    # ---- final per-utterance scores (tiny gathers in glue) -------------------
    b_idx = jnp.arange(batch)
    path = beta_rows[b_idx, u_arr[:batch]]                    # alpha[T-1, U]
    final_row = (o_arr[:batch] + (t_arr[:batch] - 1) * (u_arr[:batch] + 1)
                 + u_arr[:batch])
    final_lpb = lpb_flat[final_row]                           # lp_blank[T-1, U]
    loss = -(path + final_lpb)

    if reduction == "mean":
        return jnp.mean(loss).reshape(1)
    return jnp.sum(loss).reshape(1)


class TransducerLoss:
    """JAX/Pallas port of optimized_transducer.TransducerLoss (forward only)."""

    def __init__(self, blank: int, reduction: str = "mean"):
        assert reduction in ("mean", "sum")
        self.blank = blank
        self.reduction = reduction

    def __call__(self, logits, targets, logit_lengths, target_lengths):
        return transducer_loss(logits, targets, logit_lengths, target_lengths,
                               self.blank, self.reduction)

    # TODO(synk): backward (in-place gradient written into `logits`) is not
    # implemented; only the forward loss is computed here.


# ------------------------- pure-numpy reference -------------------------------
def _log_softmax_np(x):
    m = x.max(axis=-1, keepdims=True)
    return x - m - np.log(np.exp(x - m).sum(axis=-1, keepdims=True))


def reference_transducer_loss(logits, targets, logit_lengths, target_lengths,
                              blank, reduction):
    logits = np.asarray(logits, np.float64)
    targets = np.asarray(targets)
    losses = []
    off = 0
    for b in range(len(logit_lengths)):
        T = int(logit_lengths[b])
        U = int(target_lengths[b])
        lp = _log_softmax_np(logits[off:off + T * (U + 1)].reshape(T, U + 1, -1))
        off += T * (U + 1)
        alpha = np.full((T, U + 1), -np.inf)
        alpha[0, 0] = 0.0
        for t in range(T):
            for u in range(U + 1):
                if t == 0 and u == 0:
                    continue
                cands = []
                if t > 0:
                    cands.append(alpha[t - 1, u] + lp[t - 1, u, blank])
                if u > 0:
                    cands.append(alpha[t, u - 1] + lp[t, u - 1, targets[b, u - 1]])
                alpha[t, u] = np.logaddexp.reduce(cands)
        losses.append(-(alpha[T - 1, U] + lp[T - 1, U, blank]))
    losses = np.asarray(losses)
    return losses.mean() if reduction == "mean" else losses.sum()


if __name__ == "__main__":
    key = jax.random.PRNGKey(0)
    batch, vocab, blank = 2, 32, 0
    logit_lengths = jnp.array([8, 6], jnp.int32)     # T_i
    target_lengths = jnp.array([4, 3], jnp.int32)    # U_i (no blank counted)
    max_u = int(np.asarray(target_lengths).max())
    sum_tu = int(np.sum(np.asarray(logit_lengths) * (np.asarray(target_lengths) + 1)))

    k1, k2 = jax.random.split(key)
    logits = jax.random.normal(k1, (sum_tu, vocab), jnp.float32)
    targets = jax.random.randint(k2, (batch, max_u), 1, vocab, dtype=jnp.int32)

    loss_mean = TransducerLoss(blank=blank, reduction="mean")(
        logits, targets, logit_lengths, target_lengths)
    loss_mean = jax.block_until_ready(loss_mean)
    ref_mean = reference_transducer_loss(np.asarray(logits), np.asarray(targets),
                                         np.asarray(logit_lengths),
                                         np.asarray(target_lengths), blank, "mean")
    assert np.allclose(np.asarray(loss_mean)[0], ref_mean, rtol=1e-3, atol=1e-3), (
        loss_mean, ref_mean)

    loss_sum = TransducerLoss(blank=blank, reduction="sum")(
        logits, targets, logit_lengths, target_lengths)
    loss_sum = jax.block_until_ready(loss_sum)
    ref_sum = reference_transducer_loss(np.asarray(logits), np.asarray(targets),
                                        np.asarray(logit_lengths),
                                        np.asarray(target_lengths), blank, "sum")
    assert np.allclose(np.asarray(loss_sum)[0], ref_sum, rtol=1e-3, atol=1e-3), (
        loss_sum, ref_sum)

    print("KERNEL_OK")
</pallas_src>

<mosaic_0001>
module attributes {stable_mosaic.version = 11 : i64} {
  func.func @_logprob_kernel(%arg0: i32, %arg1: memref<64x128xf32, #tpu.memory_space<vmem>>, %arg2: memref<64x1xi32, #tpu.memory_space<vmem>>, %arg3: memref<64x2xf32, #tpu.memory_space<vmem>>) attributes {dimension_semantics = [#tpu.dimension_semantics<parallel>], iteration_bounds = array<i64: 1>, scalar_prefetch = 0 : i64, scratch_operands = 0 : i64, tpu.core_type = #tpu.core_type<tc>, window_params = [{transform_indices = @transform_0, window_bounds = array<i64: 64, 128>}, {transform_indices = @transform_1, window_bounds = array<i64: 64, 1>}, {transform_indices = @transform_2, window_bounds = array<i64: 64, 2>}]} {
    %c0 = arith.constant 0 : index
    %c0_0 = arith.constant 0 : index
    %0 = vector.load %arg1[%c0, %c0_0] : memref<64x128xf32, #tpu.memory_space<vmem>>, vector<64x128xf32>
    %cst = arith.constant dense<0xFF800000> : vector<64xf32>
    %1 = vector.multi_reduction <maximumf>, %0, %cst [1] : vector<64x128xf32> to vector<64xf32>
    %2 = vector.shape_cast %1 : vector<64xf32> to vector<64x1xf32>
    %3 = vector.broadcast %2 : vector<64x1xf32> to vector<64x128xf32>
    %4 = arith.subf %0, %3 : vector<64x128xf32>
    %5 = math.exp %4 : vector<64x128xf32>
    %cst_1 = arith.constant dense<0.000000e+00> : vector<64xf32>
    %6 = vector.multi_reduction <add>, %5, %cst_1 [1] : vector<64x128xf32> to vector<64xf32>
    %7 = vector.shape_cast %6 : vector<64xf32> to vector<64x1xf32>
    %8 = math.log %7 : vector<64x1xf32>
    %9 = arith.addf %2, %8 : vector<64x1xf32>
    %10 = vector.extract_strided_slice %0 {offsets = [0, 0], sizes = [64, 1], strides = [1, 1]} : vector<64x128xf32> to vector<64x1xf32>
    %11 = arith.subf %10, %9 : vector<64x1xf32>
    %c0_2 = arith.constant 0 : index
    %c0_3 = arith.constant 0 : index
    %12 = vector.load %arg3[%c0_2, %c0_3] : memref<64x2xf32, #tpu.memory_space<vmem>>, vector<64x1xf32>
    tpu.vector_store %arg3[%c0_2, %c0_3], %11 {strides = array<i32>} : memref<64x2xf32, #tpu.memory_space<vmem>>, vector<64x1xf32>,
    %c0_4 = arith.constant 0 : index
    %c0_5 = arith.constant 0 : index
    %13 = vector.load %arg2[%c0_4, %c0_5] : memref<64x1xi32, #tpu.memory_space<vmem>>, vector<64x1xi32>
    %14 = tpu.iota {dimensions = array<i32: 1>} : vector<64x128xi32>
    %15 = vector.broadcast %13 : vector<64x1xi32> to vector<64x128xi32>
    %16 = arith.cmpi eq, %14, %15 : vector<64x128xi32>
    %cst_6 = arith.constant 0.000000e+00 : f32
    %17 = vector.broadcast %cst_6 : f32 to vector<64x128xf32>
    %18 = arith.select %16, %0, %17 : vector<64x128xi1>, vector<64x128xf32>
    %cst_7 = arith.constant dense<0.000000e+00> : vector<64xf32>
    %19 = vector.multi_reduction <add>, %18, %cst_7 [1] : vector<64x128xf32> to vector<64xf32>
    %20 = vector.shape_cast %19 : vector<64xf32> to vector<64x1xf32>
    %21 = arith.subf %20, %9 : vector<64x1xf32>
    %c0_8 = arith.constant 0 : index
    %c1 = arith.constant 1 : index
    %22 = vector.load %arg3[%c0_8, %c1] : memref<64x2xf32, #tpu.memory_space<vmem>>, vector<64x1xf32>
    tpu.vector_store %arg3[%c0_8, %c1], %21 {strides = array<i32>} : memref<64x2xf32, #tpu.memory_space<vmem>>, vector<64x1xf32>,
    return
  }
  func.func @transform_0(%arg0: i32) -> (i32, i32) {
    %c0_i32 = arith.constant 0 : i32
    %c0_i32_0 = arith.constant 0 : i32
    return %arg0, %c0_i32 : i32, i32
  }
  func.func @transform_1(%arg0: i32) -> (i32, i32) {
    %c0_i32 = arith.constant 0 : i32
    %c0_i32_0 = arith.constant 0 : i32
    return %arg0, %c0_i32 : i32, i32
  }
  func.func @transform_2(%arg0: i32) -> (i32, i32) {
    %c0_i32 = arith.constant 0 : i32
    %c0_i32_0 = arith.constant 0 : i32
    return %arg0, %c0_i32 : i32, i32
  }
}

</mosaic_0001>

<bundles_post_ra>
// kernel: tpu_custom_call.1
= control target key start
LH: loop header
LB: loop body
LE: loop exit
PB: predicated region body
PF: predicated region fallthrough
CT: control target
= control target key end

     0   :  { %v239_v3 = vmov 0   ;;  %v124_v43 = vlaneseq  ;;  %vm107_vm8 = vcmask 7168   ;;  %vm190_vm9 = vcmask 15368   ;;  %s447_s0 = inlined_call_operand.vmem [shape: f32[64,128], index: 0, kind: input, shape index: {}]   ;;  %s448_s1 = inlined_call_operand.vmem [shape: s32[64,1], index: 1, kind: input, shape index: {}]   ;;  %s449_s2 = inlined_call_operand.vmem [shape: f32[64,2], index: 2, kind: output, shape index: {}]  }
   0x1   :  { %v258_v0 = vld [vmem:[%s447_s0 + $0x10] sm:$0xff]  ;;  %v263_v1 = vld [vmem:[%s447_s0] sm:$0xff]  ;;  %206 = vset.pattern.permute.xlu0 %v239_v3  ;;  %204 = vset.pattern.permute.xlu1 %v239_v3  ;;  %v276_v4 = vld [vmem:[%s447_s0 + $0x18] sm:$0xff] }
   0x2   :  { %v268_v2 = vld [vmem:[%s447_s0 + $0x20] sm:$0xff]  ;;  %23 = vmax.xlane.f32.xlu1 %v258_v0  ;;  %19 = vmax.xlane.f32.xlu0 %v263_v1  ;;  %v281_v5 = vld [vmem:[%s447_s0 + $0x8] sm:$0xff]  ;;  %v294_v7 = vld [vmem:[%s447_s0 + $0x38] sm:$0xff]  ;;  %v125_v44 = vand.u32 127, %v124_v43 }
   0x3   :  { %27 = vmax.xlane.f32.xlu2 %v268_v2  ;;  %v286_v6 = vld [vmem:[%s447_s0 + $0x28] sm:$0xff]  ;;  %v299_v8 = vld [vmem:[%s447_s0 + $0x30] sm:$0xff]  ;;  %v116_v11 = vld [vmem:[%s448_s1] sm:$0xff] }
   0x4   :  { %205 = vset.pattern.permute.xlu2 %v239_v3  ;;  %v117_v9 = vld [vmem:[%s448_s1 + $0x8] sm:$0xff]  ;;  %v118_v10 = vld [vmem:[%s448_s1 + $0x10] sm:$0xff]  ;;  %v119_v12 = vld [vmem:[%s448_s1 + $0x18] sm:$0xff] }
   0x5   :  { %v120_v13 = vld [vmem:[%s448_s1 + $0x20] sm:$0xff]  ;;  %v121_v14 = vld [vmem:[%s448_s1 + $0x28] sm:$0xff]  ;;  %v122_v15 = vld [vmem:[%s448_s1 + $0x30] sm:$0xff] }
   0x6   :  { %v123_v16 = vld [vmem:[%s448_s1 + $0x38] sm:$0xff] }
   0xa   :  { %25 = vmax.xlane.f32.xlu1 %v276_v4  ;;  %21 = vmax.xlane.f32.xlu0 %v281_v5 }
   0xb   :  { %29 = vmax.xlane.f32.xlu2 %v286_v6 }
  0x12   :  { %33 = vmax.xlane.f32.xlu1 %v294_v7  ;;  %31 = vmax.xlane.f32.xlu0 %v299_v8 }
  0x23   :  { %130 = vperm.xlu2 %205, %v117_v9  }
  0x26   :  { %133 = vperm.xlu0 %206, %v118_v10  }
  0x2b   :  { %127 = vperm.xlu1 %204, %v116_v11   ;;  %136 = vperm.xlu2 %205, %v119_v12  }
  0x33   :  { %139 = vperm.xlu1 %204, %v120_v13   ;;  %142 = vperm.xlu2 %205, %v121_v14  }
  0x3b   :  { %145 = vperm.xlu1 %204, %v122_v15   ;;  %148 = vperm.xlu2 %205, %v123_v16  }
  0x75   :  { %v327_v17 = vpop.xlane.xlu1 %23  ;;  %v329_v18 = vpop.xlane.xlu0 %19 }
  0x76   :  { %v35_v19 = vsub.f32 %v263_v1, %v329_v18  ;;  %v333_v20 = vpop.xlane.xlu2 %27  ;;  %v37_v48 = vsub.f32 %v258_v0, %v327_v17 }
  0x77   :  { %v39_v29 = vsub.f32 %v268_v2, %v333_v20 }
  0x78   :  { %v43_v21 = vmul.f32 1.442695, %v35_v19  ;;  %v47_v50 = vmul.f32 1.442695, %v37_v48 }
  0x79   :  { %v51_v31 = vmul.f32 1.442695, %v39_v29 }
  0x7a   :  { %207 = vpow2.f32 %v43_v21 }
  0x7d   :  { %v335_v22 = vpop.xlane.xlu1 %25  ;;  %v337_v23 = vpop.xlane.xlu0 %21 }
  0x7e   :  { %v38_v24 = vsub.f32 %v276_v4, %v335_v22  ;;  %v36_v25 = vsub.f32 %v281_v5, %v337_v23  ;;  %v345_v30 = vpop.xlane.xlu2 %29 }
  0x7f   :  { %v40_v55 = vsub.f32 %v286_v6, %v345_v30 }
  0x80   :  { %v49_v26 = vmul.f32 1.442695, %v38_v24  ;;  %v45_v27 = vmul.f32 1.442695, %v36_v25  ;;  %v208_v28 = vpop.eup %207 }
  0x81   :  { %59 = vadd.xlane.f32.xlu2 %v208_v28  ;;  %v53_v56 = vmul.f32 1.442695, %v40_v55 }
  0x82   :  { %209 = vpow2.f32 %v49_v26 }
  0x83   :  { %211 = vpow2.f32 %v45_v27 }
  0x84   :  { %213 = vpow2.f32 %v51_v31 }
  0x85   :  { %v347_v32 = vpop.xlane.xlu0 %31  ;;  %v351_v35 = vpop.xlane.xlu1 %33 }
  0x86   :  { %v41_v33 = vsub.f32 %v299_v8, %v347_v32  ;;  %v42_v38 = vsub.f32 %v294_v7, %v351_v35  ;;  %v131_v39 = vpop.permute.xlu2 %130 }
  0x87   :  { %vm151_vm1 = vcmp.eq.s32.totalorder %v125_v44, %v131_v39 }
  0x88   :  { %v210_v34 = vpop.eup %209  ;;  %v55_v36 = vmul.f32 1.442695, %v41_v33  ;;  %v57_v41 = vmul.f32 1.442695, %v42_v38  ;;  %v159_v54 = vsel %vm151_vm1, %v281_v5, 0.0 }
  0x89   :  { %v212_v37 = vpop.eup %211  ;;  %65 = vadd.xlane.f32.xlu2 %v210_v34 }
  0x8a   :  { %61 = vadd.xlane.f32.xlu0 %v212_v37  ;;  %215 = vpow2.f32 %v55_v36  ;;  %v214_v40 = vpop.eup %213 }
  0x8b   :  { %217 = vpow2.f32 %v57_v41 }
  0x8c   :  { %219 = vpow2.f32 %v47_v50 }
  0x8d   :  { %221 = vpow2.f32 %v53_v56 }
  0x8e   :  { %v137_v45 = vpop.permute.xlu2 %136 }
  0x8f   :  { %vm153_vm6 = vcmp.eq.s32.totalorder %v125_v44, %v137_v45 }
  0x90   :  { %v216_v42 = vpop.eup %215  ;;  %v161_v3 = vsel %vm153_vm6, %v276_v4, 0.0 }
  0x91   :  { %71 = vadd.xlane.f32.xlu2 %v216_v42  ;;  %v218_v47 = vpop.eup %217 }
  0x92   :  { %67 = vadd.xlane.f32.xlu0 %v214_v40  ;;  %v220_v58 = vpop.eup %219 }
  0x93   :  { %v222_v62 = vpop.eup %221 }
  0x96   :  { %v143_v52 = vpop.permute.xlu2 %142 }
  0x97   :  { %vm155_vm3 = vcmp.eq.s32.totalorder %v125_v44, %v143_v52 }
  0x98   :  { %v134_v46 = vpop.permute.xlu0 %133  ;;  %v163_v60 = vsel %vm155_vm3, %v286_v6, 0.0 }
  0x99   :  { %vm152_vm0 = vcmp.eq.s32.totalorder %v125_v44, %v134_v46 }
  0x9a   :  { %73 = vadd.xlane.f32.xlu0 %v218_v47  ;;  %v160_v49 = vsel %vm152_vm0, %v258_v0, 0.0 }
  0x9b   :  { %170 = vadd.xlane.f32.xlu2 %v160_v49 }
  0x9d   :  { %v128_v51 = vpop.permute.xlu1 %127 }
  0x9e   :  { %vm150_vm2 = vcmp.eq.s32.totalorder %v125_v44, %v128_v51  ;;  %v149_v61 = vpop.permute.xlu2 %148 }
  0x9f   :  { %v158_v53 = vsel %vm150_vm2, %v263_v1, 0.0  ;;  %vm157_vm5 = vcmp.eq.s32.totalorder %v125_v44, %v149_v61 }
  0xa0   :  { %166 = vadd.xlane.f32.xlu1 %v158_v53  ;;  %v165_v63 = vsel %vm157_vm5, %v294_v7, 0.0 }
  0xa2   :  { %168 = vadd.xlane.f32.xlu0 %v159_v54 }
  0xa5   :  { %v140_v57 = vpop.permute.xlu1 %139 }
  0xa6   :  { %vm154_vm4 = vcmp.eq.s32.totalorder %v125_v44, %v140_v57 }
  0xa7   :  { %v162_v59 = vsel %vm154_vm4, %v268_v2, 0.0 }
  0xa8   :  { %174 = vadd.xlane.f32.xlu2 %v162_v59  ;;  %63 = vadd.xlane.f32.xlu1 %v220_v58 }
  0xaa   :  { %176 = vadd.xlane.f32.xlu0 %v163_v60 }
  0xad   :  { %v146_v9 = vpop.permute.xlu1 %145 }
  0xae   :  { %vm156_vm7 = vcmp.eq.s32.totalorder %v125_v44, %v146_v9 }
  0xaf   :  { %v164_v10 = vsel %vm156_vm7, %v299_v8, 0.0 }
  0xb0   :  { %180 = vadd.xlane.f32.xlu2 %v165_v63  ;;  %69 = vadd.xlane.f32.xlu1 %v222_v62 }
  0xb8   :  { %172 = vadd.xlane.f32.xlu1 %v161_v3 }
  0xc0   :  { %178 = vadd.xlane.f32.xlu1 %v164_v10 }
  0xf4   :  { %v60_v11 = vpop.xlane.xlu2 %59 }
  0xf5   :  { %223 = vlog2.f32 %v60_v11 }
  0xfb   :  { %v224_v12 = vpop.eup %223 }
  0xfc   :  { %v76_v13 = vmul.f32 0.6931472, %v224_v12  ;;  %v66_v14 = vpop.xlane.xlu2 %65 }
  0xfd   :  { %v62_v15 = vpop.xlane.xlu0 %61  ;;  %225 = vlog2.f32 %v66_v14 }
  0xfe   :  { %227 = vlog2.f32 %v62_v15  ;;  %v91_v16 = vadd.f32 %v76_v13, %v329_v18 }
 0x100   :  { %v99_v19 = vsub.f32 %v263_v1, %v91_v16 }
 0x102   :  { %108 = vst.msk [vmem:[%s449_s2] sm:$0xff] %vm107_vm8, %v99_v19 }
 0x103   :  { %v226_v21 = vpop.eup %225 }
 0x104   :  { %v228_v24 = vpop.eup %227  ;;  %v82_v25 = vmul.f32 0.6931472, %v226_v21  ;;  %v72_v26 = vpop.xlane.xlu2 %71 }
 0x105   :  { %v68_v27 = vpop.xlane.xlu0 %67  ;;  %v78_v28 = vmul.f32 0.6931472, %v228_v24  ;;  %229 = vlog2.f32 %v72_v26 }
 0x106   :  { %231 = vlog2.f32 %v68_v27  ;;  %v94_v29 = vadd.f32 %v82_v25, %v335_v22 }
 0x107   :  { %v92_v18 = vadd.f32 %v78_v28, %v337_v23 }
 0x108   :  { %v102_v31 = vsub.f32 %v276_v4, %v94_v29 }
 0x109   :  { %v100_v1 = vsub.f32 %v281_v5, %v92_v18 }
 0x10a   :  { %111 = vst.msk [vmem:[%s449_s2 + $0x18] sm:$0xff] %vm107_vm8, %v102_v31 }
 0x10b   :  { %v230_v33 = vpop.eup %229  ;;  %109 = vst.msk [vmem:[%s449_s2 + $0x8] sm:$0xff] %vm107_vm8, %v100_v1 }
 0x10c   :  { %v232_v34 = vpop.eup %231  ;;  %v88_v36 = vmul.f32 0.6931472, %v230_v33 }
 0x10d   :  { %v74_v22 = vpop.xlane.xlu0 %73  ;;  %v84_v37 = vmul.f32 0.6931472, %v232_v34 }
 0x10e   :  { %233 = vlog2.f32 %v74_v22  ;;  %v97_v4 = vadd.f32 %v88_v36, %v347_v32  ;;  %v171_v23 = vpop.xlane.xlu2 %170 }
 0x10f   :  { %v95_v5 = vadd.f32 %v84_v37, %v333_v20 }
 0x110   :  { %v105_v38 = vsub.f32 %v299_v8, %v97_v4 }
 0x111   :  { %v103_v39 = vsub.f32 %v268_v2, %v95_v5 }
 0x112   :  { %114 = vst.msk [vmem:[%s449_s2 + $0x30] sm:$0xff] %vm107_vm8, %v105_v38 }
 0x113   :  { %v167_v40 = vpop.xlane.xlu1 %166  ;;  %112 = vst.msk [vmem:[%s449_s2 + $0x20] sm:$0xff] %vm107_vm8, %v103_v39 }
 0x114   :  { %v234_v41 = vpop.eup %233  ;;  %v182_v42 = vsub.f32 %v167_v40, %v91_v16 }
 0x115   :  { %v90_v20 = vmul.f32 0.6931472, %v234_v41  ;;  %v169_v32 = vpop.xlane.xlu0 %168 }
 0x116   :  { %191 = vst.msk [vmem:[%s449_s2] sm:$0xff] %vm190_vm9, %v182_v42  ;;  %v183_v2 = vsub.f32 %v169_v32, %v92_v18 }
 0x117   :  { %v98_v8 = vadd.f32 %v90_v20, %v351_v35 }
 0x118   :  { %192 = vst.msk [vmem:[%s449_s2 + $0x8] sm:$0xff] %vm190_vm9, %v183_v2 }
 0x119   :  { %v106_v43 = vsub.f32 %v294_v7, %v98_v8 }
 0x11b   :  { %v175_v44 = vpop.xlane.xlu2 %174  ;;  %v64_v45 = vpop.xlane.xlu1 %63  ;;  %115 = vst.msk [vmem:[%s449_s2 + $0x38] sm:$0xff] %vm107_vm8, %v106_v43 }
 0x11c   :  { %v186_v46 = vsub.f32 %v175_v44, %v95_v5  ;;  %235 = vlog2.f32 %v64_v45 }
 0x11d   :  { %v177_v57 = vpop.xlane.xlu0 %176 }
 0x11e   :  { %195 = vst.msk [vmem:[%s449_s2 + $0x20] sm:$0xff] %vm190_vm9, %v186_v46 }
 0x122   :  { %v236_v35 = vpop.eup %235 }
 0x123   :  { %v80_v47 = vmul.f32 0.6931472, %v236_v35  ;;  %v181_v48 = vpop.xlane.xlu2 %180  ;;  %v70_v49 = vpop.xlane.xlu1 %69 }
 0x124   :  { %v189_v50 = vsub.f32 %v181_v48, %v98_v8  ;;  %237 = vlog2.f32 %v70_v49 }
 0x125   :  { %v93_v7 = vadd.f32 %v80_v47, %v327_v17 }
 0x126   :  { %198 = vst.msk [vmem:[%s449_s2 + $0x38] sm:$0xff] %vm190_vm9, %v189_v50 }
 0x127   :  { %v101_v51 = vsub.f32 %v258_v0, %v93_v7  ;;  %v184_v52 = vsub.f32 %v171_v23, %v93_v7 }
 0x129   :  { %110 = vst.msk [vmem:[%s449_s2 + $0x10] sm:$0xff] %vm107_vm8, %v101_v51 }
 0x12a   :  { %v238_v53 = vpop.eup %237  ;;  %193 = vst.msk [vmem:[%s449_s2 + $0x10] sm:$0xff] %vm190_vm9, %v184_v52 }
 0x12b   :  { %v86_v17 = vmul.f32 0.6931472, %v238_v53  ;;  %v173_v54 = vpop.xlane.xlu1 %172 }
 0x12c   :  { %v185_v55 = vsub.f32 %v173_v54, %v94_v29 }
 0x12d   :  { %v96_v56 = vadd.f32 %v86_v17, %v345_v30 }
 0x12e   :  { %194 = vst.msk [vmem:[%s449_s2 + $0x18] sm:$0xff] %vm190_vm9, %v185_v55 }
 0x12f   :  { %v104_v0 = vsub.f32 %v286_v6, %v96_v56  ;;  %v187_v58 = vsub.f32 %v177_v57, %v96_v56 }
 0x131   :  { %113 = vst.msk [vmem:[%s449_s2 + $0x28] sm:$0xff] %vm107_vm8, %v104_v0 }
 0x132   :  { %196 = vst.msk [vmem:[%s449_s2 + $0x28] sm:$0xff] %vm190_vm9, %v187_v58 }
 0x133   :  { %v179_v30 = vpop.xlane.xlu1 %178 }
 0x134   :  { %v188_v59 = vsub.f32 %v179_v30, %v97_v4 }
 0x136   :  { %197 = vst.msk [vmem:[%s449_s2 + $0x30] sm:$0xff] %vm190_vm9, %v188_v59 }

</bundles_post_ra>
